<compile_context>
chip_gen: v7x
topology: tpu7x:2x2x1
jax: 0.10.0
libtpu: 0.0.40
codegen_flags: <defaults>
</compile_context>

<pallas_src>
import jax
import jax.numpy as jnp
from jax.experimental import pallas as pl
from jax.experimental.pallas import tpu as pltpu

# ----------------------------- configuration -----------------------------
AUG_DESC_SIZE_CONFIG = {'crop': 4, 'color': 4, 'flip': 1, 'blur': 1,
                        'grayscale': 1, 'color_diff': 3}

BATCH        = 8
OUT_DIM      = 32                      # out_dim
AUG_COND     = ['crop', 'color']       # args.aug_cond
AUG_NN_WIDTH = 16                      # args.aug_nn_width
AUG_NN_DEPTH = 2                       # args.aug_nn_depth
PRED_DEPTH   = 2                       # predictor_depth
AUG_IN       = sum(v for k, v in AUG_DESC_SIZE_CONFIG.items() if k in AUG_COND)  # 8
PRED_HIDDEN  = OUT_DIM // 4            # 8
PROJ_IN      = OUT_DIM + AUG_NN_WIDTH  # proj-cat: 48
EPS          = 1e-5


def _r8(n):
    return ((n + 7) // 8) * 8


# Packed parameter-slab layout: all matmul weights stacked on the sublane axis,
# each block starting at an 8-row-aligned offset, lanes starting at 0, followed
# by an 8-row block of row vectors (biases / BN gammas / BN betas).
R_AW0  = 0                               # aug Linear0 weight  (AUG_IN, W)
R_AW1  = R_AW0 + _r8(AUG_IN)             # aug Linear1 weight  (W, W)
R_PW0  = R_AW1 + _r8(AUG_NN_WIDTH)       # pred Linear0 weight (PROJ_IN, PRED_HIDDEN)
R_PW1  = R_PW0 + _r8(PROJ_IN)            # pred Linear1 weight (PRED_HIDDEN, OUT_DIM)
R_VEC  = R_PW1 + _r8(PRED_HIDDEN)        # row-vector block (8 rows):
                                         #   +0 ab0  +1 ag0  +2 abe0  +3 ag1  +4 abe1
                                         #   +5 pb0  +6 pg0  +7 pbe0  (rows 5-7: first PRED_HIDDEN lanes)
P_ROWS = R_VEC + 8                       # 88
P_COLS = max(AUG_NN_WIDTH, PRED_HIDDEN, OUT_DIM)  # 32


# ------------------------------ Pallas kernel -----------------------------
def aug_ss_predictor_kernel(x_ref, aug_ref, p_ref, out_ref):
    f32 = jnp.float32
    B = x_ref.shape[0]
    inv_b = 1.0 / B

    def bn(h, gamma, beta):
        # Training-mode BN with two *independent* reductions so the XLU
        # reduces can overlap; var = E[h^2] - mu^2 (biased, matches PyTorch
        # training-mode normalization).
        s1 = jnp.sum(h, axis=0, keepdims=True)
        s2 = jnp.sum(h * h, axis=0, keepdims=True)
        mu = s1 * inv_b
        var = s2 * inv_b - mu * mu
        return gamma * (h - mu) * jax.lax.rsqrt(var + EPS) + beta

    # -- static slices of the packed parameter slab (aligned, zero-cost views) --
    vec = p_ref[R_VEC:R_VEC + 8, 0:AUG_NN_WIDTH]              # (8, 16)
    ab0, ag0, abe0 = vec[0:1, :], vec[1:2, :], vec[2:3, :]
    ag1, abe1      = vec[3:4, :], vec[4:5, :]
    pb0  = vec[5:6, 0:PRED_HIDDEN]
    pg0  = vec[6:7, 0:PRED_HIDDEN]
    pbe0 = vec[7:8, 0:PRED_HIDDEN]

    aw0 = p_ref[R_AW0:R_AW0 + AUG_IN,       0:AUG_NN_WIDTH]   # (8, 16)
    aw1 = p_ref[R_AW1:R_AW1 + AUG_NN_WIDTH, 0:AUG_NN_WIDTH]   # (16, 16)
    pw0 = p_ref[R_PW0:R_PW0 + PROJ_IN,      0:PRED_HIDDEN]    # (48, 8)
    pw1 = p_ref[R_PW1:R_PW1 + PRED_HIDDEN,  0:OUT_DIM]        # (8, 32)

    # ---- aug_processor: Lin+BN+ReLU, Lin(no bias)+BN ----
    h = jnp.dot(aug_ref[...], aw0, preferred_element_type=f32) + ab0
    h = jnp.maximum(bn(h, ag0, abe0), 0.0)
    h = jnp.dot(h, aw1, preferred_element_type=f32)
    aug_out = bn(h, ag1, abe1)

    # ---- proj-cat + predictor: single dot on the lane-axis concat ----
    z = jnp.concatenate([x_ref[...], aug_out], axis=1)        # (B, 48)
    z = jnp.dot(z, pw0, preferred_element_type=f32) + pb0
    z = jnp.maximum(bn(z, pg0, pbe0), 0.0)
    out_ref[...] = jnp.dot(z, pw1, preferred_element_type=f32)


# ------------------------------- wrapper ----------------------------------
def _aug_ss_predictor(x, aug_desc, p_slab):
    B = x.shape[0]
    vmem = pl.BlockSpec(memory_space=pltpu.MemorySpace.VMEM)
    # Rough advisory cost: 4 tiny matmuls (~16 KFLOP) + BN elementwise,
    # 3 rsqrt rows, ~13 KiB moved.
    cost = pl.CostEstimate(flops=20000, transcendentals=40, bytes_accessed=13056)
    return pl.pallas_call(
        aug_ss_predictor_kernel,
        out_shape=jax.ShapeDtypeStruct((B, OUT_DIM), jnp.float32),
        in_specs=[vmem, vmem, vmem],
        out_specs=vmem,
        cost_estimate=cost,
    )(x, aug_desc, p_slab)


aug_ss_predictor = jax.jit(_aug_ss_predictor)


# ------------------------- parameter construction -------------------------
def init_params(key):
    """Deterministic synthetic parameters matching the module's shapes."""
    ks = jax.random.split(key, 8)
    scale = 0.1
    # aug_processor: Linear(AUG_IN->W)+BN+ReLU, Linear(W->W, no bias)+BN (last_bn=True)
    aw0 = scale * jax.random.normal(ks[0], (AUG_IN, AUG_NN_WIDTH), jnp.float32)
    ab0 = scale * jax.random.normal(ks[1], (AUG_NN_WIDTH,), jnp.float32)
    ag0 = jnp.ones((AUG_NN_WIDTH,), jnp.float32)
    abe0 = jnp.zeros((AUG_NN_WIDTH,), jnp.float32)
    aw1 = scale * jax.random.normal(ks[2], (AUG_NN_WIDTH, AUG_NN_WIDTH), jnp.float32)
    ag1 = jnp.ones((AUG_NN_WIDTH,), jnp.float32)
    abe1 = jnp.zeros((AUG_NN_WIDTH,), jnp.float32)
    # predictor: Linear(PROJ_IN->PRED_HIDDEN)+BN+ReLU, Linear(PRED_HIDDEN->OUT_DIM, no bias)
    pw0 = scale * jax.random.normal(ks[3], (PROJ_IN, PRED_HIDDEN), jnp.float32)
    pb0 = scale * jax.random.normal(ks[4], (PRED_HIDDEN,), jnp.float32)
    pg0 = jnp.ones((PRED_HIDDEN,), jnp.float32)
    pbe0 = jnp.zeros((PRED_HIDDEN,), jnp.float32)
    pw1 = scale * jax.random.normal(ks[5], (PRED_HIDDEN, OUT_DIM), jnp.float32)
    return (aw0, ab0, ag0, abe0, aw1, ag1, abe1, pw0, pb0, pg0, pbe0, pw1)


def pack_params(params):
    """Pack all parameters into a single (P_ROWS, P_COLS) slab (the kernel input)."""
    (aw0, ab0, ag0, abe0, aw1, ag1, abe1, pw0, pb0, pg0, pbe0, pw1) = params

    p = jnp.zeros((P_ROWS, P_COLS), jnp.float32)
    p = p.at[R_AW0:R_AW0 + AUG_IN,       0:AUG_NN_WIDTH].set(aw0)
    p = p.at[R_AW1:R_AW1 + AUG_NN_WIDTH, 0:AUG_NN_WIDTH].set(aw1)
    p = p.at[R_PW0:R_PW0 + PROJ_IN,      0:PRED_HIDDEN].set(pw0)
    p = p.at[R_PW1:R_PW1 + PRED_HIDDEN,  0:OUT_DIM].set(pw1)

    p = p.at[R_VEC + 0, 0:AUG_NN_WIDTH].set(ab0)
    p = p.at[R_VEC + 1, 0:AUG_NN_WIDTH].set(ag0)
    p = p.at[R_VEC + 2, 0:AUG_NN_WIDTH].set(abe0)
    p = p.at[R_VEC + 3, 0:AUG_NN_WIDTH].set(ag1)
    p = p.at[R_VEC + 4, 0:AUG_NN_WIDTH].set(abe1)
    p = p.at[R_VEC + 5, 0:PRED_HIDDEN].set(pb0)
    p = p.at[R_VEC + 6, 0:PRED_HIDDEN].set(pg0)
    p = p.at[R_VEC + 7, 0:PRED_HIDDEN].set(pbe0)
    return p


def reference(x, aug_desc, params):
    """Pure-JAX reference of the same forward pass (for a sanity check)."""
    (aw0, ab0, ag0, abe0, aw1, ag1, abe1, pw0, pb0, pg0, pbe0, pw1) = params

    def bn(h, g, b):
        mu = h.mean(0, keepdims=True)
        var = ((h - mu) ** 2).mean(0, keepdims=True)
        return g * (h - mu) / jnp.sqrt(var + EPS) + b

    h = jnp.maximum(bn(aug_desc @ aw0 + ab0, ag0, abe0), 0.0)
    aug_out = bn(h @ aw1, ag1, abe1)
    z = jnp.concatenate([x, aug_out], axis=1)
    h = jnp.maximum(bn(z @ pw0 + pb0, pg0, pbe0), 0.0)
    return h @ pw1


if __name__ == "__main__":
    key = jax.random.PRNGKey(0)
    kx, ka, kp = jax.random.split(key, 3)
    x = jax.random.normal(kx, (BATCH, OUT_DIM), jnp.float32)        # backbone features
    aug_desc = jax.random.normal(ka, (BATCH, AUG_IN), jnp.float32)  # crop(4)+color(4)
    params = init_params(kp)
    p_slab = pack_params(params)

    out = aug_ss_predictor(x, aug_desc, p_slab)
    out = jax.block_until_ready(out)

    ref = reference(x, aug_desc, params)
    assert out.shape == (BATCH, OUT_DIM), out.shape
    assert jnp.allclose(out, ref, atol=1e-4, rtol=1e-4), float(jnp.abs(out - ref).max())
    print("KERNEL_OK")
</pallas_src>

<mosaic_0001>
module attributes {stable_mosaic.version = 11 : i64} {
  func.func @aug_ss_predictor_kernel(%arg0: memref<8x32xf32, #tpu.memory_space<vmem>>, %arg1: memref<8x8xf32, #tpu.memory_space<vmem>>, %arg2: memref<88x32xf32, #tpu.memory_space<vmem>>, %arg3: memref<8x32xf32, #tpu.memory_space<vmem>>) attributes {dimension_semantics = [], scalar_prefetch = 0 : i64, scratch_operands = 0 : i64, tpu.core_type = #tpu.core_type<tc>} {
    %c80 = arith.constant 80 : index
    %c0 = arith.constant 0 : index
    %0 = vector.load %arg2[%c80, %c0] : memref<88x32xf32, #tpu.memory_space<vmem>>, vector<8x16xf32>
    %1 = vector.extract_strided_slice %0 {offsets = [0, 0], sizes = [1, 16], strides = [1, 1]} : vector<8x16xf32> to vector<1x16xf32>
    %2 = vector.extract_strided_slice %0 {offsets = [1, 0], sizes = [1, 16], strides = [1, 1]} : vector<8x16xf32> to vector<1x16xf32>
    %3 = vector.extract_strided_slice %0 {offsets = [2, 0], sizes = [1, 16], strides = [1, 1]} : vector<8x16xf32> to vector<1x16xf32>
    %4 = vector.extract_strided_slice %0 {offsets = [3, 0], sizes = [1, 16], strides = [1, 1]} : vector<8x16xf32> to vector<1x16xf32>
    %5 = vector.extract_strided_slice %0 {offsets = [4, 0], sizes = [1, 16], strides = [1, 1]} : vector<8x16xf32> to vector<1x16xf32>
    %6 = vector.extract_strided_slice %0 {offsets = [5, 0], sizes = [1, 8], strides = [1, 1]} : vector<8x16xf32> to vector<1x8xf32>
    %7 = vector.extract_strided_slice %0 {offsets = [6, 0], sizes = [1, 8], strides = [1, 1]} : vector<8x16xf32> to vector<1x8xf32>
    %8 = vector.extract_strided_slice %0 {offsets = [7, 0], sizes = [1, 8], strides = [1, 1]} : vector<8x16xf32> to vector<1x8xf32>
    %c0_0 = arith.constant 0 : index
    %c0_1 = arith.constant 0 : index
    %9 = vector.load %arg2[%c0_0, %c0_1] : memref<88x32xf32, #tpu.memory_space<vmem>>, vector<8x16xf32>
    %c8 = arith.constant 8 : index
    %c0_2 = arith.constant 0 : index
    %10 = vector.load %arg2[%c8, %c0_2] : memref<88x32xf32, #tpu.memory_space<vmem>>, vector<16x16xf32>
    %c24 = arith.constant 24 : index
    %c0_3 = arith.constant 0 : index
    %11 = vector.load %arg2[%c24, %c0_3] : memref<88x32xf32, #tpu.memory_space<vmem>>, vector<48x8xf32>
    %c72 = arith.constant 72 : index
    %c0_4 = arith.constant 0 : index
    %12 = vector.load %arg2[%c72, %c0_4] : memref<88x32xf32, #tpu.memory_space<vmem>>, vector<8x32xf32>
    %c0_5 = arith.constant 0 : index
    %c0_6 = arith.constant 0 : index
    %13 = vector.load %arg1[%c0_5, %c0_6] : memref<8x8xf32, #tpu.memory_space<vmem>>, vector<8x8xf32>
    %cst = arith.constant dense<0.000000e+00> : vector<8x16xf32>
    %14 = tpu.matmul %13, %9, %cst {dimension_numbers = #tpu.dot_dimension_numbers<[1], [0], [0], [1], [0, 0, 1, 1], [], []>} : vector<8x8xf32>, vector<8x16xf32>, vector<8x16xf32> -> vector<8x16xf32>
    %15 = vector.broadcast %1 : vector<1x16xf32> to vector<8x16xf32>
    %16 = arith.addf %14, %15 : vector<8x16xf32>
    %cst_7 = arith.constant dense<0.000000e+00> : vector<16xf32>
    %17 = vector.multi_reduction <add>, %16, %cst_7 [0] : vector<8x16xf32> to vector<16xf32>
    %18 = vector.shape_cast %17 : vector<16xf32> to vector<1x16xf32>
    %19 = arith.mulf %16, %16 : vector<8x16xf32>
    %cst_8 = arith.constant dense<0.000000e+00> : vector<16xf32>
    %20 = vector.multi_reduction <add>, %19, %cst_8 [0] : vector<8x16xf32> to vector<16xf32>
    %21 = vector.shape_cast %20 : vector<16xf32> to vector<1x16xf32>
    %cst_9 = arith.constant 1.250000e-01 : f32
    %22 = vector.broadcast %cst_9 : f32 to vector<1x16xf32>
    %23 = arith.mulf %18, %22 : vector<1x16xf32>
    %cst_10 = arith.constant 1.250000e-01 : f32
    %24 = vector.broadcast %cst_10 : f32 to vector<1x16xf32>
    %25 = arith.mulf %21, %24 : vector<1x16xf32>
    %26 = arith.mulf %23, %23 : vector<1x16xf32>
    %27 = arith.subf %25, %26 : vector<1x16xf32>
    %28 = vector.broadcast %23 : vector<1x16xf32> to vector<8x16xf32>
    %29 = arith.subf %16, %28 : vector<8x16xf32>
    %30 = vector.broadcast %2 : vector<1x16xf32> to vector<8x16xf32>
    %31 = arith.mulf %30, %29 : vector<8x16xf32>
    %cst_11 = arith.constant 9.99999974E-6 : f32
    %32 = vector.broadcast %cst_11 : f32 to vector<1x16xf32>
    %33 = arith.addf %27, %32 : vector<1x16xf32>
    %34 = math.rsqrt %33 : vector<1x16xf32>
    %35 = vector.broadcast %34 : vector<1x16xf32> to vector<8x16xf32>
    %36 = arith.mulf %31, %35 : vector<8x16xf32>
    %37 = vector.broadcast %3 : vector<1x16xf32> to vector<8x16xf32>
    %38 = arith.addf %36, %37 : vector<8x16xf32>
    %cst_12 = arith.constant 0.000000e+00 : f32
    %39 = vector.broadcast %cst_12 : f32 to vector<8x16xf32>
    %40 = arith.maximumf %38, %39 : vector<8x16xf32>
    %cst_13 = arith.constant dense<0.000000e+00> : vector<8x16xf32>
    %41 = tpu.matmul %40, %10, %cst_13 {dimension_numbers = #tpu.dot_dimension_numbers<[1], [0], [0], [1], [0, 0, 1, 1], [], []>} : vector<8x16xf32>, vector<16x16xf32>, vector<8x16xf32> -> vector<8x16xf32>
    %cst_14 = arith.constant dense<0.000000e+00> : vector<16xf32>
    %42 = vector.multi_reduction <add>, %41, %cst_14 [0] : vector<8x16xf32> to vector<16xf32>
    %43 = vector.shape_cast %42 : vector<16xf32> to vector<1x16xf32>
    %44 = arith.mulf %41, %41 : vector<8x16xf32>
    %cst_15 = arith.constant dense<0.000000e+00> : vector<16xf32>
    %45 = vector.multi_reduction <add>, %44, %cst_15 [0] : vector<8x16xf32> to vector<16xf32>
    %46 = vector.shape_cast %45 : vector<16xf32> to vector<1x16xf32>
    %cst_16 = arith.constant 1.250000e-01 : f32
    %47 = vector.broadcast %cst_16 : f32 to vector<1x16xf32>
    %48 = arith.mulf %43, %47 : vector<1x16xf32>
    %cst_17 = arith.constant 1.250000e-01 : f32
    %49 = vector.broadcast %cst_17 : f32 to vector<1x16xf32>
    %50 = arith.mulf %46, %49 : vector<1x16xf32>
    %51 = arith.mulf %48, %48 : vector<1x16xf32>
    %52 = arith.subf %50, %51 : vector<1x16xf32>
    %53 = vector.broadcast %48 : vector<1x16xf32> to vector<8x16xf32>
    %54 = arith.subf %41, %53 : vector<8x16xf32>
    %55 = vector.broadcast %4 : vector<1x16xf32> to vector<8x16xf32>
    %56 = arith.mulf %55, %54 : vector<8x16xf32>
    %cst_18 = arith.constant 9.99999974E-6 : f32
    %57 = vector.broadcast %cst_18 : f32 to vector<1x16xf32>
    %58 = arith.addf %52, %57 : vector<1x16xf32>
    %59 = math.rsqrt %58 : vector<1x16xf32>
    %60 = vector.broadcast %59 : vector<1x16xf32> to vector<8x16xf32>
    %61 = arith.mulf %56, %60 : vector<8x16xf32>
    %62 = vector.broadcast %5 : vector<1x16xf32> to vector<8x16xf32>
    %63 = arith.addf %61, %62 : vector<8x16xf32>
    %c0_19 = arith.constant 0 : index
    %c0_20 = arith.constant 0 : index
    %64 = vector.load %arg0[%c0_19, %c0_20] : memref<8x32xf32, #tpu.memory_space<vmem>>, vector<8x32xf32>
    %65 = tpu.concatenate %64, %63 in 1 : vector<8x32xf32>, vector<8x16xf32> -> vector<8x48xf32>
    %cst_21 = arith.constant dense<0.000000e+00> : vector<8x8xf32>
    %66 = tpu.matmul %65, %11, %cst_21 {dimension_numbers = #tpu.dot_dimension_numbers<[1], [0], [0], [1], [0, 0, 1, 1], [], []>} : vector<8x48xf32>, vector<48x8xf32>, vector<8x8xf32> -> vector<8x8xf32>
    %67 = vector.broadcast %6 : vector<1x8xf32> to vector<8x8xf32>
    %68 = arith.addf %66, %67 : vector<8x8xf32>
    %cst_22 = arith.constant dense<0.000000e+00> : vector<8xf32>
    %69 = vector.multi_reduction <add>, %68, %cst_22 [0] : vector<8x8xf32> to vector<8xf32>
    %70 = vector.shape_cast %69 : vector<8xf32> to vector<1x8xf32>
    %71 = arith.mulf %68, %68 : vector<8x8xf32>
    %cst_23 = arith.constant dense<0.000000e+00> : vector<8xf32>
    %72 = vector.multi_reduction <add>, %71, %cst_23 [0] : vector<8x8xf32> to vector<8xf32>
    %73 = vector.shape_cast %72 : vector<8xf32> to vector<1x8xf32>
    %cst_24 = arith.constant 1.250000e-01 : f32
    %74 = vector.broadcast %cst_24 : f32 to vector<1x8xf32>
    %75 = arith.mulf %70, %74 : vector<1x8xf32>
    %cst_25 = arith.constant 1.250000e-01 : f32
    %76 = vector.broadcast %cst_25 : f32 to vector<1x8xf32>
    %77 = arith.mulf %73, %76 : vector<1x8xf32>
    %78 = arith.mulf %75, %75 : vector<1x8xf32>
    %79 = arith.subf %77, %78 : vector<1x8xf32>
    %80 = vector.broadcast %75 : vector<1x8xf32> to vector<8x8xf32>
    %81 = arith.subf %68, %80 : vector<8x8xf32>
    %82 = vector.broadcast %7 : vector<1x8xf32> to vector<8x8xf32>
    %83 = arith.mulf %82, %81 : vector<8x8xf32>
    %cst_26 = arith.constant 9.99999974E-6 : f32
    %84 = vector.broadcast %cst_26 : f32 to vector<1x8xf32>
    %85 = arith.addf %79, %84 : vector<1x8xf32>
    %86 = math.rsqrt %85 : vector<1x8xf32>
    %87 = vector.broadcast %86 : vector<1x8xf32> to vector<8x8xf32>
    %88 = arith.mulf %83, %87 : vector<8x8xf32>
    %89 = vector.broadcast %8 : vector<1x8xf32> to vector<8x8xf32>
    %90 = arith.addf %88, %89 : vector<8x8xf32>
    %cst_27 = arith.constant 0.000000e+00 : f32
    %91 = vector.broadcast %cst_27 : f32 to vector<8x8xf32>
    %92 = arith.maximumf %90, %91 : vector<8x8xf32>
    %cst_28 = arith.constant dense<0.000000e+00> : vector<8x32xf32>
    %93 = tpu.matmul %92, %12, %cst_28 {dimension_numbers = #tpu.dot_dimension_numbers<[1], [0], [0], [1], [0, 0, 1, 1], [], []>} : vector<8x8xf32>, vector<8x32xf32>, vector<8x32xf32> -> vector<8x32xf32>
    %c0_29 = arith.constant 0 : index
    %c0_30 = arith.constant 0 : index
    %94 = vector.load %arg3[%c0_29, %c0_30] : memref<8x32xf32, #tpu.memory_space<vmem>>, vector<8x32xf32>
    tpu.vector_store %arg3[%c0_29, %c0_30], %93 {strides = array<i32>} : memref<8x32xf32, #tpu.memory_space<vmem>>, vector<8x32xf32>,
    return
  }
}

</mosaic_0001>

<bundles_post_ra>
// kernel: _aug_ss_predictor.1
= control target key start
LH: loop header
LB: loop body
LE: loop exit
PB: predicated region body
PF: predicated region fallthrough
CT: control target
= control target key end

     0   :  { %vm31_vm0 = vcmask 64512   ;;  %v550_v2 = vmov 0.0   ;;  %vm551_vm1 = vmmov 0   ;;  %s661_s0 = inlined_call_operand.vmem [shape: f32[8,32], index: 0, kind: input, shape index: {}]   ;;  %s662_s1 = inlined_call_operand.vmem [shape: f32[8,8], index: 1, kind: input, shape index: {}]   ;;  %s663_s2 = inlined_call_operand.vmem [shape: f32[88,32], index: 2, kind: input, shape index: {}]   ;;  %s664_s3 = inlined_call_operand.hbm [shape: f32[8,32], index: 3, kind: output, shape index: {}]  }
   0x1   :  { %v16_v0 = vld [vmem:[%s663_s2] sm:$0xff]  ;;  %471 = vmatprep.subr.mxu1 %v550_v2  ;;  %473 = vmatprep.mubr.msk.f32.mxu1 %vm551_vm1, %v550_v2 }
   0x2   :  { %v26_v1 = vld [vmem:[%s662_s1] sm:$0xff] }
   0x3   :  { %8 = vsyncpa [#allocation3], 0  ;;  %472 = vmatpush3.msra.mxu1 %v16_v0  ;;  %495 = vmatprep.mubr.msk.f32.mxu0 %vm551_vm1, %v550_v2  ;;  %v17_v3 = vld [vmem:[%s663_s2 + $0x8] sm:$0xff]  ;;  %v18_v4 = vld [vmem:[%s663_s2 + $0x10] sm:$0xff]  ;;  %v552_v6 = vmov 0.0|0.0   ;;  %v27_v7 = vlaneseq  ;;  %vm105_vm2 = vcmask 130048  }
   0x4   :  { %474 = vmatmul.mubr.msk.f32.vlgmr.msra.gmra.mrb[0].mxu1 %vm31_vm0, %v26_v1  ;;  %v504_v5 = vpack.c.bf16 %v18_v4, %v17_v3  ;;  %503 = vmatprep.subr.bf16.mxu1 %v552_v6  ;;  %v597_v10 = vld [vmem:[%s663_s2 + $0x50] sm:$0xff]  ;;  %v19_v45 = vld [vmem:[%s663_s2 + $0x18] sm:$0xff]  ;;  %v20_v46 = vld [vmem:[%s663_s2 + $0x20] sm:$0xff]  ;;  %s553_s6 = smov 32   ;;  %vm251_vm3 = vcmask 261120   ;;  %vm257_vm4 = vcmask 392192  }
   0x5   :  { %480 = vmatprep.mubr.msk.f32.mxu1 %vm551_vm1, %v550_v2  ;;  %506 = vmatprep.subr.bf16.mxu0 %v552_v6  ;;  %v591_v8 = vshrl.u32 %v27_v7, 7  ;;  %v21_v47 = vld [vmem:[%s663_s2 + $0x28] sm:$0xff]  ;;  %v507_v48 = vpack.c.bf16 %v20_v46, %v19_v45  ;;  %v22_v49 = vld [vmem:[%s663_s2 + $0x30] sm:$0xff]  ;;  %v23_v51 = vld [vmem:[%s663_s2 + $0x38] sm:$0xff] }
   0x6   :  { %505 = vmatpush3.bf16.msra.mxu1 %v504_v5  ;;  %v510_v50 = vpack.c.bf16 %v22_v49, %v21_v47  ;;  %v24_v52 = vld [vmem:[%s663_s2 + $0x40] sm:$0xff] }
   0x7   :  { %498 = vmatprep.subr.mxu1 %v550_v2  ;;  %v29_v9 = vsub.s32 0, %v591_v8  ;;  %v128_v35 = vsub.s32 1, %v591_v8  ;;  %v136_v38 = vsub.s32 2, %v591_v8  ;;  %508 = vmatpush3.bf16.msra.mxu0 %v507_v48  ;;  %v513_v53 = vpack.c.bf16 %v24_v52, %v23_v51 }
   0x8   :  { %509 = vmatprep.subr.bf16.mxu0 %v552_v6  ;;  %v353_v52 = vsub.s32 6, %v591_v8 }
   0x9   :  { %v30_v11 = vrot.slane %v597_v10, %v29_v9  ;;  %v129_v37 = vrot.slane %v597_v10, %v128_v35  ;;  %v137_v40 = vrot.slane %v597_v10, %v136_v38 }
   0xb   :  { %511 = vmatpush3.bf16.msra.mxu0 %v510_v50 }
   0xc   :  { %512 = vmatprep.subr.bf16.mxu0 %v552_v6 }
   0xf   :  { %514 = vmatpush3.bf16.msra.mxu0 %v513_v53 }
  0xd7   :  { %v101_v12 = vpop.f32.mrb[0].mxu1 }
  0xd8   :  { %v102_v13 = vadd.f32 %v101_v12, %v30_v11  ;;  %v475_v14 = vpop.f32.mrb[1].mxu1 }
  0xd9   :  { %v235_v14 = vsub.s32 3, %v591_v8 }
  0xda   :  { %v106_v15 = vsel %vm105_vm2, %v102_v13, 0.0  ;;  %v113_v16 = vmul.f32 %v102_v13, %v102_v13 }
  0xdb   :  { %v107_v17 = vrot.slane %v106_v15, 4 }
  0xdc   :  { %v114_v18 = vsel %vm105_vm2, %v113_v16, 0.0  ;;  %v236_v16 = vrot.slane %v597_v10, %v235_v14 }
  0xdd   :  { %v108_v19 = vadd.f32 %v107_v17, %v106_v15  ;;  %v115_v20 = vrot.slane %v114_v18, 4  ;;  %v243_v17 = vsub.s32 4, %v591_v8 }
  0xdf   :  { %v109_v21 = vrot.slane %v108_v19, 2  ;;  %v116_v22 = vadd.f32 %v115_v20, %v114_v18 }
  0xe1   :  { %v110_v23 = vadd.f32 %v109_v21, %v108_v19  ;;  %v117_v24 = vrot.slane %v116_v22, 2  ;;  %v244_v19 = vrot.slane %v597_v10, %v243_v17 }
  0xe3   :  { %v111_v25 = vrot.slane %v110_v23, 1  ;;  %v118_v26 = vadd.f32 %v117_v24, %v116_v22 }
  0xe5   :  { %v112_v27 = vadd.f32 %v111_v25, %v110_v23  ;;  %v119_v28 = vrot.slane %v118_v26, 1  ;;  %v246_v23 = vld [vmem:[%s661_s0] sm:$0xff]  ;;  %s554_s0 = smov [#allocation2]  }
  0xe7   :  { %v120_v29 = vadd.f32 %v119_v28, %v118_v26  ;;  %v121_v30 = vmul.f32 0.125, %v112_v27  ;;  %v25_v26 = vld [vmem:[%s663_s2 + $0x48] sm:$0xff]  ;;  %v255_v27 = vsub.s32 5, %v591_v8  ;;  %s445_s2 = sshll.u32 %s554_s0, 4  ;;  %s446_s2 = int_to_ptr.vmem [resolvable:$true] %s445_s2 }
  0xe8   :  { %s526_s11 = scalar_lea.vmem %s446_s2, 128  ;;  %p531_p1 = scmp.lt.s32.totalorder %s446_s2, %s446_s2 }
  0xe9   :  { %v122_v31 = vmul.f32 0.125, %v120_v29  ;;  %v123_v32 = vmul.f32 %v121_v30, %v121_v30  ;;  %v125_v36 = vsub.f32 %v102_v13, %v121_v30  ;;  %v256_v28 = vrot.slane %v597_v10, %v255_v27  ;;  %p527_p0 = scmp.ne.s32.totalorder %s446_s2, %s526_s11  ;;  %p532_p2 = scmp.lt.s32.totalorder %s526_s11, %s526_s11 }
  0xeb   :  { %v124_v33 = vsub.f32 %v122_v31, %v123_v32  ;;  %v130_v39 = vmul.f32 %v129_v37, %v125_v36  ;;  %p533_p3 = por %p532_p2, %p531_p1 }
  0xed   :  { %v131_v34 = vadd.f32 1e-05, %v124_v33  ;;  %p534_p4 = pnand %p533_p3, %p527_p0 }
  0xef   :  { %520 = vrsqrt.f32 %v131_v34 }
  0xf9   :  { %v521_v41 = vpop.eup %520 }
  0xfa   :  { %v133_v42 = vmul.f32 %v521_v41, %v130_v39 }
  0xfc   :  { %v138_v43 = vadd.f32 %v137_v40, %v133_v42 }
  0xfe   :  { %v139_v44 = vmax.f32 %v138_v43, 0.0 }
 0x100   :  { %481 = vmatmul.mubr.msk.f32.vlgmr.msra.gmra.mrb[2].mxu1 %vm105_vm2, %v139_v44 }
 0x101   :  { %500 = vmatprep.mubr.msk.f32.mxu1 %vm551_vm1, %v550_v2  ;;  %499 = vmatpush3.msra.mxu1 %v25_v26 }
 0x1d3   :  { %v209_v54 = vpop.f32.mrb[2].mxu1 }
 0x1d4   :  { %v213_v55 = vsel %vm105_vm2, %v209_v54, 0.0  ;;  %v220_v56 = vmul.f32 %v209_v54, %v209_v54  ;;  %v482_v57 = vpop.f32.mrb[3].mxu1 }
 0x1d5   :  { %v214_v58 = vrot.slane %v213_v55, 4 }
 0x1d6   :  { %v221_v59 = vsel %vm105_vm2, %v220_v56, 0.0 }
 0x1d7   :  { %v215_v60 = vadd.f32 %v214_v58, %v213_v55  ;;  %v222_v61 = vrot.slane %v221_v59, 4  ;;  %v361_v55 = vsub.s32 7, %v591_v8 }
 0x1d9   :  { %v216_v62 = vrot.slane %v215_v60, 2  ;;  %v223_v63 = vadd.f32 %v222_v61, %v221_v59  ;;  %v362_v57 = vrot.slane %v597_v10, %v361_v55 }
 0x1db   :  { %v217_v0 = vadd.f32 %v216_v62, %v215_v60  ;;  %v224_v1 = vrot.slane %v223_v63, 2 }
 0x1dd   :  { %v218_v2 = vrot.slane %v217_v0, 1  ;;  %v225_v3 = vadd.f32 %v224_v1, %v223_v63 }
 0x1df   :  { %v219_v4 = vadd.f32 %v218_v2, %v217_v0  ;;  %v226_v5 = vrot.slane %v225_v3, 1 }
 0x1e1   :  { %v227_v6 = vadd.f32 %v226_v5, %v225_v3  ;;  %v228_v7 = vmul.f32 0.125, %v219_v4 }
 0x1e3   :  { %v229_v9 = vmul.f32 0.125, %v227_v6  ;;  %v230_v11 = vmul.f32 %v228_v7, %v228_v7  ;;  %v232_v15 = vsub.f32 %v209_v54, %v228_v7  ;;  %v354_v54 = vrot.slane %v597_v10, %v353_v52 }
 0x1e5   :  { %v231_v12 = vsub.f32 %v229_v9, %v230_v11  ;;  %v237_v18 = vmul.f32 %v236_v16, %v232_v15 }
 0x1e7   :  { %v238_v13 = vadd.f32 1e-05, %v231_v12 }
 0x1e9   :  { %522 = vrsqrt.f32 %v238_v13 }
 0x1f3   :  { %v523_v20 = vpop.eup %522 }
 0x1f4   :  { %v240_v21 = vmul.f32 %v523_v20, %v237_v18 }
 0x1f6   :  { %v245_v22 = vadd.f32 %v244_v19, %v240_v21 }
 0x1f8   :  { %248 = vrot.lane.b32.xlu0 %v245_v22, %s553_s6 }
 0x26a   :  { %v249_v24 = vpop.permute.xlu0 %248 }
 0x26b   :  { %v252_v25 = vsel %vm251_vm3, %v246_v23, %v249_v24 }
 0x26c   :  { %496 = vmatmul.mubr.msk.f32.vlgmr.msra.gmra.mrb[0].mxu0 %vm257_vm4, %v252_v25 }
 0x33f   :  { %v327_v29 = vpop.f32.mrb[0].mxu0 }
 0x340   :  { %v328_v30 = vadd.f32 %v327_v29, %v256_v28  ;;  %v497_v31 = vpop.f32.mrb[1].mxu0 }
 0x342   :  { %v331_v32 = vsel %vm31_vm0, %v328_v30, 0.0  ;;  %v338_v33 = vmul.f32 %v328_v30, %v328_v30 }
 0x343   :  { %v332_v34 = vrot.slane %v331_v32, 4 }
 0x344   :  { %v339_v35 = vsel %vm31_vm0, %v338_v33, 0.0 }
 0x345   :  { %v333_v36 = vadd.f32 %v332_v34, %v331_v32  ;;  %v340_v37 = vrot.slane %v339_v35, 4 }
 0x347   :  { %v334_v38 = vrot.slane %v333_v36, 2  ;;  %v341_v39 = vadd.f32 %v340_v37, %v339_v35 }
 0x349   :  { %v335_v40 = vadd.f32 %v334_v38, %v333_v36  ;;  %v342_v41 = vrot.slane %v341_v39, 2 }
 0x34b   :  { %v336_v42 = vrot.slane %v335_v40, 1  ;;  %v343_v43 = vadd.f32 %v342_v41, %v341_v39 }
 0x34d   :  { %v337_v44 = vadd.f32 %v336_v42, %v335_v40  ;;  %v344_v45 = vrot.slane %v343_v43, 1 }
 0x34f   :  { %v345_v46 = vadd.f32 %v344_v45, %v343_v43  ;;  %v346_v47 = vmul.f32 0.125, %v337_v44 }
 0x351   :  { %v347_v48 = vmul.f32 0.125, %v345_v46  ;;  %v348_v49 = vmul.f32 %v346_v47, %v346_v47  ;;  %v350_v53 = vsub.f32 %v328_v30, %v346_v47 }
 0x353   :  { %v349_v50 = vsub.f32 %v347_v48, %v348_v49  ;;  %v355_v56 = vmul.f32 %v354_v54, %v350_v53 }
 0x355   :  { %v356_v51 = vadd.f32 1e-05, %v349_v50 }
 0x357   :  { %524 = vrsqrt.f32 %v356_v51 }
 0x361   :  { %v525_v58 = vpop.eup %524 }
 0x362   :  { %v358_v59 = vmul.f32 %v525_v58, %v355_v56 }
 0x364   :  { %v363_v60 = vadd.f32 %v362_v57, %v358_v59 }
 0x366   :  { %v364_v61 = vmax.f32 %v363_v60, 0.0 }
 0x368   :  { %501 = vmatmul.mubr.msk.f32.vlgmr.msra.gmra.mrb[4].mxu1 %vm31_vm0, %v364_v61 }
 0x43b   :  { %v434_v62 = vpop.f32.mrb[4].mxu1 }
 0x43c   :  { %438 = vst.msk [vmem:[#allocation2] sm:$0xff] %vm251_vm3, %v434_v62  ;;  %v502_v63 = vpop.f32.mrb[5].mxu1 }
 0x43d   :  { %537 = shalt.err (!%p534_p4)
}
 0x43e   :  { %s538_s14 = scalar_lea.hbm %s664_s3, 128 }
 0x43f   :  { %p539_p5 = scmp.ne.s32.totalorder %s664_s3, %s538_s14  ;;  %p542_p6 = scmp.lt.u32.totalorder %s538_s14, %s664_s3 }
 0x441   :  { %p544_p7 = pnand %p542_p6, %p539_p5 }
 0x443   :  { %547 = shalt.err (!%p544_p7)
}
 0x444   :  { %448 = dma.vmem_to_hbm [thread:$0]  %s446_s2, 128, %s664_s3, [#allocation3]  }
 0x445   :  { %548 = dma.done.wait [#allocation3], 128  }
 0x446   :  { %549 = vsyncadd [#allocation3], 4294967168 }
 0x447   :  { %452 = vsyncpa [#allocation3], 1 }

</bundles_post_ra>
